<compile_context>
chip_gen: v7x
topology: tpu7x:2x2x1
jax: 0.10.0
libtpu: 0.0.40
codegen_flags: <defaults>
</compile_context>

<pallas_src>
import functools

import jax
import jax.numpy as jnp
import numpy as np
from jax.experimental import pallas as pl
from jax.experimental.pallas import tpu as pltpu


def _round_up(x, m):
    return (x + m - 1) // m * m


def _vmem_capacity_bytes():
    try:
        return int(pltpu.get_tpu_info().vmem_capacity_bytes)
    except Exception:
        return 64 * 1024 * 1024      # conservative fallback (v7x per-TC VMEM)


def _pick_tile_l(L, max_c, ksize):
    """Largest 128-multiple time tile that keeps the per-tile working set
    comfortably inside this generation's VMEM."""
    lp128 = _round_up(L, 128)
    budget = _vmem_capacity_bytes() // 2
    # rough live bytes per time column: 2x-buffered bf16 in/out tiles,
    # bf16 window + im2col slabs, f32 acc/h/res/out intermediates.
    per_col = (4 * 2 * max_c
               + 2 * (2 * ksize + 2) * max_c
               + 4 * 5 * max_c)
    cap = max(128, budget // max(per_col, 1))
    return max(128, min(2048, (cap // 128) * 128, lp128))


# ----------------------------------------------------------------------------
# Pallas kernel: one TemporalBlock, one (batch, time-tile) grid point.
# The time axis is sequential; xhist/hhist scratch carries the causal history
# (exactly reproducing the zero left-padding + Chomp1d of both convs).
# ----------------------------------------------------------------------------
def _temporal_block_kernel(x_ref, w1_ref, b1_ref, w2_ref, b2_ref, o_ref,
                           xhist_ref, hhist_ref, *,
                           ksize, dilation, pad, hw, tl, cop, has_downsample):
    # x_ref  : (cip, TL)  bf16     current time tile of the input
    # w1_ref : (R, K*cip) bf16     conv1 im2col weight; R = 2*cop when the
    #                              1x1 downsample is fused in, else cop
    # b1_ref : (R, 1)     f32
    # w2_ref : (cop, K*cop) bf16   conv2 im2col weight
    # b2_ref : (cop, 1)   f32
    # o_ref  : (cop, TL)  bf16
    # xhist  : (cip, hw)  bf16     last hw >= pad input columns (carry)
    # hhist  : (cop, hw)  bf16     last hw >= pad conv1-output columns (carry)
    i = pl.program_id(1)

    @pl.when(i == 0)
    def _():
        # zero history == the zero left-padding of both causal convs
        xhist_ref[...] = jnp.zeros_like(xhist_ref)
        hhist_ref[...] = jnp.zeros_like(hhist_ref)

    x = x_ref[...]                                            # (cip, TL) bf16
    off = hw - pad                                            # tap-0 offset

    # ---- conv1 (+ fused 1x1 residual): im2col -> ONE bf16 MXU matmul ----
    win1 = jnp.concatenate([xhist_ref[...], x], axis=1)       # (cip, hw+TL)
    cols1 = jnp.concatenate(
        [win1[:, off + j * dilation: off + j * dilation + tl]
         for j in range(ksize)], axis=0)                      # (K*cip, TL)
    acc1 = jnp.dot(w1_ref[...], cols1,
                   preferred_element_type=jnp.float32) + b1_ref[...]
    if has_downsample:
        h = jnp.maximum(acc1[:cop], 0.0)                      # (cop, TL) f32
        res = acc1[cop:]                                      # wd@x + bd, f32
    else:
        h = jnp.maximum(acc1, 0.0)
        res = x.astype(jnp.float32)                           # identity (cip==cop)
    h16 = h.astype(jnp.bfloat16)

    # ---- conv2: im2col -> ONE bf16 MXU matmul ----
    win2 = jnp.concatenate([hhist_ref[...], h16], axis=1)     # (cop, hw+TL)
    cols2 = jnp.concatenate(
        [win2[:, off + j * dilation: off + j * dilation + tl]
         for j in range(ksize)], axis=0)                      # (K*cop, TL)
    acc2 = jnp.dot(w2_ref[...], cols2,
                   preferred_element_type=jnp.float32) + b2_ref[...]
    out = jnp.maximum(acc2, 0.0)

    o_ref[...] = jnp.maximum(out + res, 0.0).astype(o_ref.dtype)

    # carry the causal history to the next time tile (128-aligned slices)
    xhist_ref[...] = win1[:, tl:]
    hhist_ref[...] = win2[:, tl:]


# ----------------------------------------------------------------------------
# Wrapper: one TemporalBlock on already-padded bf16 activations.
#   acts: (N, cip, lp) bf16 with zero-padded channels -> (N, cop, lp) bf16.
# ----------------------------------------------------------------------------
def temporal_block(acts, w1, b1, w2, b2, wd, bd, *, ksize, dilation, tile_l):
    N, cip, lp = acts.shape
    C_out, C_in, K = w1.shape
    assert K == ksize
    assert cip == _round_up(C_in, 16)
    pad = (ksize - 1) * dilation
    assert pad >= 1, "kernel_size must be >= 2 (matches the PyTorch TCN usage)"
    has_downsample = wd is not None
    if not has_downsample:
        assert C_in == C_out
    cop = _round_up(C_out, 16)
    assert tile_l % 128 == 0 and lp % tile_l == 0
    n_tiles = lp // tile_l
    hw = _round_up(pad, 128)     # lane-aligned causal-history width (>= pad)

    # Weights: pad channels to 16, im2col layout (C_out, K*C_in), bf16.
    def prep_w(w, co, ci):
        wp = jnp.pad(w, ((0, co - w.shape[0]), (0, ci - w.shape[1]), (0, 0)))
        return jnp.transpose(wp, (0, 2, 1)).reshape(co, ksize * ci).astype(jnp.bfloat16)

    def prep_b(b, co):
        return jnp.pad(b, (0, co - b.shape[0])).reshape(co, 1).astype(jnp.float32)

    w1i, b1c = prep_w(w1, cop, cip), prep_b(b1, cop)
    if has_downsample:
        # Fuse the 1x1 residual into conv1: tap K-1 of the im2col window is
        # exactly x[t] (pad = (K-1)*dilation), so placing wd in the last-tap
        # channel slot of a stacked LHS yields wd @ x with the same RHS.
        wdp = jnp.pad(wd, ((0, cop - C_out), (0, cip - C_in))).astype(jnp.bfloat16)
        wd_row = jnp.concatenate(
            [jnp.zeros((cop, (ksize - 1) * cip), jnp.bfloat16), wdp], axis=1)
        w1i = jnp.concatenate([w1i, wd_row], axis=0)          # (2*cop, K*cip)
        b1c = jnp.concatenate([b1c, prep_b(bd, cop)], axis=0)
    w2i, b2c = prep_w(w2, cop, cop), prep_b(b2, cop)
    rows = w1i.shape[0]

    kern = functools.partial(
        _temporal_block_kernel, ksize=ksize, dilation=dilation, pad=pad,
        hw=hw, tl=tile_l, cop=cop, has_downsample=has_downsample)

    return pl.pallas_call(
        kern,
        out_shape=jax.ShapeDtypeStruct((N, cop, lp), jnp.bfloat16),
        grid_spec=pltpu.PrefetchScalarGridSpec(
            num_scalar_prefetch=0,
            grid=(N, n_tiles),
            in_specs=[
                pl.BlockSpec((pl.Squeezed(), cip, tile_l), lambda n, i: (n, 0, i)),
                pl.BlockSpec((rows, ksize * cip), lambda n, i: (0, 0)),
                pl.BlockSpec((rows, 1), lambda n, i: (0, 0)),
                pl.BlockSpec((cop, ksize * cop), lambda n, i: (0, 0)),
                pl.BlockSpec((cop, 1), lambda n, i: (0, 0)),
            ],
            out_specs=pl.BlockSpec((pl.Squeezed(), cop, tile_l),
                                   lambda n, i: (n, 0, i)),
            scratch_shapes=[pltpu.VMEM((cip, hw), jnp.bfloat16),
                            pltpu.VMEM((cop, hw), jnp.bfloat16)],
        ),
        compiler_params=pltpu.CompilerParams(
            dimension_semantics=("parallel", "arbitrary"),
            vmem_limit_bytes=int(_vmem_capacity_bytes() * 3 // 4)),
    )(acts, w1i, b1c, w2i, b2c)


# ----------------------------------------------------------------------------
# Full TemporalConvNet forward: pad once, run blocks on padded bf16
# activations, slice once at the end.
# ----------------------------------------------------------------------------
def temporal_conv_net(x, params, ksize, tile_l=None):
    N, C0, L = x.shape
    max_c = max([_round_up(C0, 16)]
                + [_round_up(p["w1"].shape[0], 16) for p in params])
    if tile_l is None:
        tile_l = _pick_tile_l(L, max_c, ksize)
    assert tile_l % 128 == 0
    lp = _round_up(L, tile_l)

    cip0 = _round_up(C0, 16)
    acts = jnp.pad(x, ((0, 0), (0, cip0 - C0), (0, lp - L))).astype(jnp.bfloat16)
    for p in params:
        acts = temporal_block(acts, p["w1"], p["b1"], p["w2"], p["b2"],
                              p["wd"], p["bd"], ksize=ksize,
                              dilation=p["dilation"], tile_l=tile_l)
    C_last = params[-1]["w1"].shape[0]
    return acts[:, :C_last, :L].astype(jnp.float32)


# ----------------------------------------------------------------------------
# Deterministic parameter construction (emulates weight_norm'ed Conv1d).
# ----------------------------------------------------------------------------
def _weightnorm_conv_params(key, c_out, c_in, k):
    kv, kg, kb = jax.random.split(key, 3)
    v = 0.1 * jax.random.normal(kv, (c_out, c_in, k), jnp.float32)
    g = 1.0 + 0.1 * jax.random.normal(kg, (c_out,), jnp.float32)
    norm = jnp.sqrt(jnp.sum(v * v, axis=(1, 2), keepdims=True)) + 1e-12
    w = g[:, None, None] * v / norm                         # weight_norm, dim=0
    b = 0.05 * jax.random.normal(kb, (c_out,), jnp.float32)
    return w, b


def build_params(key, num_inputs, num_channels, ksize):
    params = []
    for i, c_out in enumerate(num_channels):
        c_in = num_inputs if i == 0 else num_channels[i - 1]
        key, k1, k2, kd = jax.random.split(key, 4)
        w1, b1 = _weightnorm_conv_params(k1, c_out, c_in, ksize)
        w2, b2 = _weightnorm_conv_params(k2, c_out, c_out, ksize)
        if c_in != c_out:
            kdw, kdb = jax.random.split(kd)
            wd = 0.1 * jax.random.normal(kdw, (c_out, c_in), jnp.float32)
            bd = 0.05 * jax.random.normal(kdb, (c_out,), jnp.float32)
        else:  # PyTorch uses x directly (downsample=None) -> identity residual
            wd, bd = None, None
        params.append(dict(w1=w1, b1=b1, w2=w2, b2=b2, wd=wd, bd=bd,
                           dilation=2 ** i))
    return params


# ----------------------------------------------------------------------------
# Pure-JAX reference emulating the kernel's numerics (bf16 MXU operands with
# f32 accumulation, bf16 inter-block activations) so the comparison is tight.
# ----------------------------------------------------------------------------
def _ref_causal_conv(x16, w, b, dilation):
    k = w.shape[-1]
    pad = (k - 1) * dilation
    y = jax.lax.conv_general_dilated(
        x16, w.astype(jnp.bfloat16),
        window_strides=(1,), padding=[(pad, pad)],
        rhs_dilation=(dilation,), dimension_numbers=("NCH", "OIH", "NCH"),
        preferred_element_type=jnp.float32)
    y = y[:, :, :x16.shape[2]]                              # Chomp1d
    return y + b.astype(jnp.float32)[None, :, None]


def ref_temporal_conv_net(x, params, ksize):
    a = x.astype(jnp.bfloat16)
    for p in params:
        d = p["dilation"]
        h = jax.nn.relu(_ref_causal_conv(a, p["w1"], p["b1"], d)).astype(jnp.bfloat16)
        out = jax.nn.relu(_ref_causal_conv(h, p["w2"], p["b2"], d))
        if p["wd"] is None:
            res = a.astype(jnp.float32)
        else:
            res = jnp.einsum("oc,ncl->nol",
                             p["wd"].astype(jnp.bfloat16), a,
                             preferred_element_type=jnp.float32) \
                  + p["bd"][None, :, None]
        a = jax.nn.relu(out + res).astype(jnp.bfloat16)
    return a.astype(jnp.float32)


# ----------------------------------------------------------------------------
if __name__ == "__main__":
    key = jax.random.PRNGKey(0)
    N, C_IN, L = 2, 4, 16
    NUM_CHANNELS = [8, 8]        # two TemporalBlocks, dilations 1 and 2
    KSIZE = 2

    kx, kp = jax.random.split(key)
    x = jax.random.normal(kx, (N, C_IN, L), jnp.float32)
    params = build_params(kp, C_IN, NUM_CHANNELS, KSIZE)

    y = temporal_conv_net(x, params, KSIZE)
    y = jax.block_until_ready(y)

    y_ref = ref_temporal_conv_net(x, params, KSIZE)
    assert y.shape == (N, NUM_CHANNELS[-1], L)
    # bf16 MXU operands + bf16 inter-block activations -> loose-ish tolerance.
    np.testing.assert_allclose(np.asarray(y), np.asarray(y_ref),
                               atol=2e-2, rtol=2e-2)
    print("KERNEL_OK")
</pallas_src>

<mosaic_0001>
module attributes {stable_mosaic.version = 11 : i64} {
  func.func @_temporal_block_kernel(%arg0: i32, %arg1: i32, %arg2: memref<1x16x128xbf16, #tpu.memory_space<vmem>>, %arg3: memref<32x32xbf16, #tpu.memory_space<vmem>>, %arg4: memref<32x1xf32, #tpu.memory_space<vmem>>, %arg5: memref<16x32xbf16, #tpu.memory_space<vmem>>, %arg6: memref<16x1xf32, #tpu.memory_space<vmem>>, %arg7: memref<1x16x128xbf16, #tpu.memory_space<vmem>>, %arg8: memref<16x128xbf16, #tpu.memory_space<vmem>>, %arg9: memref<16x128xbf16, #tpu.memory_space<vmem>>) attributes {dimension_semantics = [#tpu.dimension_semantics<parallel>, #tpu.dimension_semantics<arbitrary>], iteration_bounds = array<i64: 2, 1>, scalar_prefetch = 0 : i64, scratch_operands = 2 : i64, tpu.core_type = #tpu.core_type<tc>, window_params = [{transform_indices = @transform_0, window_bounds = array<i64: 1, 16, 128>}, {pipeline_mode = #tpu.pipeline_mode<synchronous>, transform_indices = @transform_1, window_bounds = array<i64: 32, 32>}, {pipeline_mode = #tpu.pipeline_mode<synchronous>, transform_indices = @transform_2, window_bounds = array<i64: 32, 1>}, {pipeline_mode = #tpu.pipeline_mode<synchronous>, transform_indices = @transform_3, window_bounds = array<i64: 16, 32>}, {pipeline_mode = #tpu.pipeline_mode<synchronous>, transform_indices = @transform_4, window_bounds = array<i64: 16, 1>}, {transform_indices = @transform_5, window_bounds = array<i64: 1, 16, 128>}]} {
    %c0_i32 = arith.constant 0 : i32
    %0 = arith.cmpi eq, %arg1, %c0_i32 : i32
    %1 = arith.extui %0 : i1 to i32
    %c0_i32_0 = arith.constant 0 : i32
    %2 = arith.cmpi ne, %1, %c0_i32_0 : i32
    scf.if %2 {
      %cst_26 = arith.constant 0.000000e+00 : bf16
      %43 = vector.broadcast %cst_26 : bf16 to vector<16x128xbf16>
      %c0_27 = arith.constant 0 : index
      %c0_28 = arith.constant 0 : index
      %44 = vector.load %arg8[%c0_27, %c0_28] : memref<16x128xbf16, #tpu.memory_space<vmem>>, vector<16x128xbf16>
      tpu.vector_store %arg8[%c0_27, %c0_28], %43 {strides = array<i32>} : memref<16x128xbf16, #tpu.memory_space<vmem>>, vector<16x128xbf16>,
      %cst_29 = arith.constant 0.000000e+00 : bf16
      %45 = vector.broadcast %cst_29 : bf16 to vector<16x128xbf16>
      %c0_30 = arith.constant 0 : index
      %c0_31 = arith.constant 0 : index
      %46 = vector.load %arg9[%c0_30, %c0_31] : memref<16x128xbf16, #tpu.memory_space<vmem>>, vector<16x128xbf16>
      tpu.vector_store %arg9[%c0_30, %c0_31], %45 {strides = array<i32>} : memref<16x128xbf16, #tpu.memory_space<vmem>>, vector<16x128xbf16>,
    } else {
    }
    %c0 = arith.constant 0 : index
    %c0_1 = arith.constant 0 : index
    %c0_2 = arith.constant 0 : index
    %3 = vector.load %arg2[%c0, %c0_1, %c0_2] : memref<1x16x128xbf16, #tpu.memory_space<vmem>>, vector<1x16x128xbf16>
    %4 = vector.shape_cast %3 : vector<1x16x128xbf16> to vector<16x128xbf16>
    %c0_3 = arith.constant 0 : index
    %c0_4 = arith.constant 0 : index
    %5 = vector.load %arg8[%c0_3, %c0_4] : memref<16x128xbf16, #tpu.memory_space<vmem>>, vector<16x128xbf16>
    %6 = tpu.concatenate %5, %4 in 1 : vector<16x128xbf16>, vector<16x128xbf16> -> vector<16x256xbf16>
    %7 = vector.extract_strided_slice %6 {offsets = [0, 127], sizes = [16, 128], strides = [1, 1]} : vector<16x256xbf16> to vector<16x128xbf16>
    %8 = vector.extract_strided_slice %6 {offsets = [0, 128], sizes = [16, 128], strides = [1, 1]} : vector<16x256xbf16> to vector<16x128xbf16>
    %9 = tpu.concatenate %7, %8 in 0 : vector<16x128xbf16>, vector<16x128xbf16> -> vector<32x128xbf16>
    %c0_5 = arith.constant 0 : index
    %c0_6 = arith.constant 0 : index
    %10 = vector.load %arg3[%c0_5, %c0_6] : memref<32x32xbf16, #tpu.memory_space<vmem>>, vector<32x32xbf16>
    %cst = arith.constant dense<0.000000e+00> : vector<32x128xf32>
    %11 = tpu.matmul %10, %9, %cst {dimension_numbers = #tpu.dot_dimension_numbers<[1], [0], [0], [1], [0, 0, 1, 1], [], []>} : vector<32x32xbf16>, vector<32x128xbf16>, vector<32x128xf32> -> vector<32x128xf32>
    %c0_7 = arith.constant 0 : index
    %c0_8 = arith.constant 0 : index
    %12 = vector.load %arg4[%c0_7, %c0_8] : memref<32x1xf32, #tpu.memory_space<vmem>>, vector<32x1xf32>
    %13 = vector.broadcast %12 : vector<32x1xf32> to vector<32x128xf32>
    %14 = arith.addf %11, %13 : vector<32x128xf32>
    %15 = vector.extract_strided_slice %14 {offsets = [0, 0], sizes = [16, 128], strides = [1, 1]} : vector<32x128xf32> to vector<16x128xf32>
    %cst_9 = arith.constant 0.000000e+00 : f32
    %16 = vector.broadcast %cst_9 : f32 to vector<16x128xf32>
    %17 = arith.maximumf %15, %16 : vector<16x128xf32>
    %18 = vector.extract_strided_slice %14 {offsets = [16, 0], sizes = [16, 128], strides = [1, 1]} : vector<32x128xf32> to vector<16x128xf32>
    %19 = arith.truncf %17 : vector<16x128xf32> to vector<16x128xbf16>
    %c0_10 = arith.constant 0 : index
    %c0_11 = arith.constant 0 : index
    %20 = vector.load %arg9[%c0_10, %c0_11] : memref<16x128xbf16, #tpu.memory_space<vmem>>, vector<16x128xbf16>
    %21 = tpu.concatenate %20, %19 in 1 : vector<16x128xbf16>, vector<16x128xbf16> -> vector<16x256xbf16>
    %22 = vector.extract_strided_slice %21 {offsets = [0, 127], sizes = [16, 128], strides = [1, 1]} : vector<16x256xbf16> to vector<16x128xbf16>
    %23 = vector.extract_strided_slice %21 {offsets = [0, 128], sizes = [16, 128], strides = [1, 1]} : vector<16x256xbf16> to vector<16x128xbf16>
    %24 = tpu.concatenate %22, %23 in 0 : vector<16x128xbf16>, vector<16x128xbf16> -> vector<32x128xbf16>
    %c0_12 = arith.constant 0 : index
    %c0_13 = arith.constant 0 : index
    %25 = vector.load %arg5[%c0_12, %c0_13] : memref<16x32xbf16, #tpu.memory_space<vmem>>, vector<16x32xbf16>
    %cst_14 = arith.constant dense<0.000000e+00> : vector<16x128xf32>
    %26 = tpu.matmul %25, %24, %cst_14 {dimension_numbers = #tpu.dot_dimension_numbers<[1], [0], [0], [1], [0, 0, 1, 1], [], []>} : vector<16x32xbf16>, vector<32x128xbf16>, vector<16x128xf32> -> vector<16x128xf32>
    %c0_15 = arith.constant 0 : index
    %c0_16 = arith.constant 0 : index
    %27 = vector.load %arg6[%c0_15, %c0_16] : memref<16x1xf32, #tpu.memory_space<vmem>>, vector<16x1xf32>
    %28 = vector.broadcast %27 : vector<16x1xf32> to vector<16x128xf32>
    %29 = arith.addf %26, %28 : vector<16x128xf32>
    %cst_17 = arith.constant 0.000000e+00 : f32
    %30 = vector.broadcast %cst_17 : f32 to vector<16x128xf32>
    %31 = arith.maximumf %29, %30 : vector<16x128xf32>
    %32 = arith.addf %31, %18 : vector<16x128xf32>
    %cst_18 = arith.constant 0.000000e+00 : f32
    %33 = vector.broadcast %cst_18 : f32 to vector<16x128xf32>
    %34 = arith.maximumf %32, %33 : vector<16x128xf32>
    %35 = arith.truncf %34 : vector<16x128xf32> to vector<16x128xbf16>
    %c0_19 = arith.constant 0 : index
    %c0_20 = arith.constant 0 : index
    %c0_21 = arith.constant 0 : index
    %36 = vector.load %arg7[%c0_19, %c0_20, %c0_21] : memref<1x16x128xbf16, #tpu.memory_space<vmem>>, vector<1x16x128xbf16>
    %37 = vector.shape_cast %36 : vector<1x16x128xbf16> to vector<16x128xbf16>
    %38 = vector.shape_cast %35 : vector<16x128xbf16> to vector<1x16x128xbf16>
    tpu.vector_store %arg7[%c0_19, %c0_20, %c0_21], %38 {strides = array<i32>} : memref<1x16x128xbf16, #tpu.memory_space<vmem>>, vector<1x16x128xbf16>,
    %39 = vector.extract_strided_slice %6 {offsets = [0, 128], sizes = [16, 128], strides = [1, 1]} : vector<16x256xbf16> to vector<16x128xbf16>
    %c0_22 = arith.constant 0 : index
    %c0_23 = arith.constant 0 : index
    %40 = vector.load %arg8[%c0_22, %c0_23] : memref<16x128xbf16, #tpu.memory_space<vmem>>, vector<16x128xbf16>
    tpu.vector_store %arg8[%c0_22, %c0_23], %39 {strides = array<i32>} : memref<16x128xbf16, #tpu.memory_space<vmem>>, vector<16x128xbf16>,
    %41 = vector.extract_strided_slice %21 {offsets = [0, 128], sizes = [16, 128], strides = [1, 1]} : vector<16x256xbf16> to vector<16x128xbf16>
    %c0_24 = arith.constant 0 : index
    %c0_25 = arith.constant 0 : index
    %42 = vector.load %arg9[%c0_24, %c0_25] : memref<16x128xbf16, #tpu.memory_space<vmem>>, vector<16x128xbf16>
    tpu.vector_store %arg9[%c0_24, %c0_25], %41 {strides = array<i32>} : memref<16x128xbf16, #tpu.memory_space<vmem>>, vector<16x128xbf16>,
    return
  }
  func.func @transform_0(%arg0: i32, %arg1: i32) -> (i32, i32, i32) {
    %c0_i32 = arith.constant 0 : i32
    %c0_i32_0 = arith.constant 0 : i32
    return %arg0, %c0_i32, %arg1 : i32, i32, i32
  }
  func.func @transform_1(%arg0: i32, %arg1: i32) -> (i32, i32) {
    %c0_i32 = arith.constant 0 : i32
    %c0_i32_0 = arith.constant 0 : i32
    %c0_i32_1 = arith.constant 0 : i32
    return %c0_i32, %c0_i32_0 : i32, i32
  }
  func.func @transform_2(%arg0: i32, %arg1: i32) -> (i32, i32) {
    %c0_i32 = arith.constant 0 : i32
    %c0_i32_0 = arith.constant 0 : i32
    %c0_i32_1 = arith.constant 0 : i32
    return %c0_i32, %c0_i32_0 : i32, i32
  }
  func.func @transform_3(%arg0: i32, %arg1: i32) -> (i32, i32) {
    %c0_i32 = arith.constant 0 : i32
    %c0_i32_0 = arith.constant 0 : i32
    %c0_i32_1 = arith.constant 0 : i32
    return %c0_i32, %c0_i32_0 : i32, i32
  }
  func.func @transform_4(%arg0: i32, %arg1: i32) -> (i32, i32) {
    %c0_i32 = arith.constant 0 : i32
    %c0_i32_0 = arith.constant 0 : i32
    %c0_i32_1 = arith.constant 0 : i32
    return %c0_i32, %c0_i32_0 : i32, i32
  }
  func.func @transform_5(%arg0: i32, %arg1: i32) -> (i32, i32, i32) {
    %c0_i32 = arith.constant 0 : i32
    %c0_i32_0 = arith.constant 0 : i32
    return %arg0, %c0_i32, %arg1 : i32, i32, i32
  }
}

</mosaic_0001>

<bundles_post_ra>
// kernel: tpu_custom_call.1
= control target key start
LH: loop header
LB: loop body
LE: loop exit
PB: predicated region body
PF: predicated region fallthrough
CT: control target
= control target key end

     0   :  { %10 = vsyncpa [#allocation5], 0  ;;  %s957_s0 = inlined_call_operand.vmem [shape: bf16[2,16,128], index: 0, kind: input, shape index: {}]   ;;  %s958_s1 = inlined_call_operand.vmem [shape: bf16[32,32], index: 1, kind: input, shape index: {}]   ;;  %s959_s2 = inlined_call_operand.vmem [shape: f32[32,1], index: 2, kind: input, shape index: {}]   ;;  %s960_s3 = inlined_call_operand.vmem [shape: bf16[16,32], index: 3, kind: input, shape index: {}]   ;;  %s961_s4 = inlined_call_operand.vmem [shape: f32[16,1], index: 4, kind: input, shape index: {}]   ;;  %s962_s5 = inlined_call_operand.hbm [shape: bf16[2,16,128], index: 5, kind: output, shape index: {}]  }
   0x1   :  { %12 = vsyncpa [#allocation5 + $0x1], 0  ;;  %s802_s18 = smov 0   ;;  %s804_s19 = smov 0  }
   0x2   :  { %s806_s20 = smov 0   ;;  %s808_s21 = smov 0  }
   0x3   :  { %s810_s22 = smov 0   ;;  %s812_s23 = smov 0  }
   0x4 LB: > { %s562_s24 = sadd.s32 4294967295, %s762_s23   ;;  %s563_s25 = sadd.s32 4294967294, %s762_s23   ;;  %s762_s23 = sphi %s812_s23, %s18_s23   ;;  %s758_s22 = sphi %s810_s22, %s969_s22   ;;  %s754_s21 = sphi %s808_s21, %s968_s21   ;;  %s750_s20 = sphi %s806_s20, %s967_s20   ;;  %s746_s19 = sphi %s804_s19, %s966_s19   ;;  %s742_s18 = sphi %s802_s18, %s965_s18  }
   0x5   : > { %s30_s26 = sadd.s32 1, %s758_s22  ;;  %s151_s27 = sadd.s32 1, %s750_s20 }
   0x6   : > { %p32_p0 = scmp.ge.s32.totalorder %s30_s26, 2  ;;  %p161_p1 = scmp.ne.s32.totalorder %s750_s20, %s746_s19 }
   0x7   : > { %p162_p2 = scmp.eq.s32.totalorder %s562_s24, 1  ;;  %p167_p3 = scmp.ne.s32.totalorder %s746_s19, %s742_s18 }
   0x8   : > { %s971_s26 = smov (%p32_p0, %s30_s26), 0  ;;  %p168_p5 = scmp.eq.s32.totalorder %s563_s25, 1 }
   0x9   : > { %p842_p4 = por %p162_p2, %p161_p1  ;;  %s146_s29 = ssub.s32 %s758_s22, %s971_s26 }
   0xa   : > { %p566_p6 = scmp.ge.s32.totalorder %s762_s23, 1  ;;  %p149_p7 = scmp.eq.s32.totalorder %s146_s29, 0 }
   0xb   : > { %p849_p8 = por %p168_p5, %p167_p3  ;;  %p209_p9 = scmp.lt.s32.totalorder %s762_s23, 3 }
   0xc   : > { %s855_s6 = scalar_select %p149_p7, %s750_s20, %s151_s27  }
   0xd   : > { %p210_p10 = pnand %p566_p6, %p209_p9 }
   0xe   : > { %p240_p11 = scmp.lt.s32.totalorder (!%p210_p10), %s754_s21, 1  ;;  %v764_v0 = vmov (!%p210_p10), 0   ;;  %s765_s12 = smov (!%p210_p10), 127   ;;  %v681_v2 = vld [vmem:[%s958_s1] sm:$0xff] (!%p210_p10)   ;;  %vm315_vm0 = vcmask (!%p210_p10), 261120   ;;  %vm311_vm1 = vcmask (!%p210_p10), 7168  }
   0xf   : > { %213 = sbr.rel (%p210_p10) target bundleno = 954 (0x3ba), region = 40  ;;  %678 = vset.pattern.permute.xlu0 (!%p210_p10), %v764_v0  ;;  %679 = vset.pattern.permute.xlu1 (!%p210_p10), %v764_v0  ;;  %s766_s13 = smov (!%p210_p10), 1   ;;  %v270_v3 = vld [vmem:[%s959_s2] sm:$0xff] (!%p210_p10)  ;;  %v271_v6 = vld [vmem:[%s959_s2 + $0x8] sm:$0xff] (!%p210_p10)  ;;  %v767_v15 = vmov (!%p210_p10), 0.0   ;;  %v272_v24 = vld [vmem:[%s959_s2 + $0x10] sm:$0xff] (!%p210_p10) }
  0x10   : > { %604 = vmatprep.mubr.msk.bf16.mxu0 (!%p210_p10), %vm315_vm0, %v681_v2  ;;  %v682_v10 = vld [vmem:[%s958_s1 + $0x8] sm:$0xff] (!%p210_p10)   ;;  %608 = vmatprep.subr.bf16.mxu1 (!%p210_p10), %v767_v15  ;;  %v380_v23 = vld [vmem:[%s961_s4] sm:$0xff] (!%p210_p10)  ;;  %vm768_vm2 = vmmov (!%p210_p10), 0   ;;  %v273_v30 = vld [vmem:[%s959_s2 + $0x18] sm:$0xff] (!%p210_p10)  ;;  %s237_s17 = sand.u32 (!%p210_p10), 1, %s746_s19   ;;  %s587_s25 = sshll.u32 (!%p210_p10), %s754_s21, 7 }
  0x11   : > { %612 = vmatprep.mubr.msk.bf16.mxu1 (!%p210_p10), %vm768_vm2, %v767_v15  ;;  %v381_v27 = vld [vmem:[%s961_s4 + $0x8] sm:$0xff] (!%p210_p10)  ;;  %v683_v32 = vld [vmem:[%s960_s3] sm:$0xff] (!%p210_p10)   ;;  %s567_s24 = sshll.u32 (!%p210_p10), %s237_s17, 3  ;;  %s907_s9 = scalar_lea.hbm (!%p210_p10), %s962_s5, %s587_s25 }
  0x12   : > { %s239_s27 = scalar_lea.vmem (!%p210_p10), [#allocation4], %s567_s24  ;;  %s911_s10 = scalar_lea.sflag (!%p210_p10), [#allocation5], %s237_s17 }
  0x13   : > { %s484_s29 = sshll.u32 (!%p210_p10), %s239_s27, 4  ;;  %s909_s29 = int_to_ptr.vmem [resolvable:$true] %s484_s29 }
  0x16   : > { %s241_s7 = scalar_select %p240_p11, %s754_s21, 1 }
  0x17   : > { %s769_s21 = smov [#allocation4]  }
  0x18   : > { %s584_s8 = sshll.u32 %s241_s7, 3 }
  0x19   : > { %s247_s11 = scalar_lea.vmem %s957_s0, %s584_s8 }
  0x1a   : > { %v680_v1 = vld [vmem:[%s247_s11] sm:$0xff]   ;;  %s684_s11 = scalar_lea.vmem %s909_s29, 128 }
  0x1b   : > { %264 = vrot.lane.b32.xlu0 %v680_v1, %s765_s12  ;;  %307 = vrot.lane.b32.xlu1 %v680_v1, %s766_s13  ;;  %p685_p12 = scmp.ne.s32.totalorder %s909_s29, %s684_s11 }
  0x1d   : > { %p686_p13 = pnand %p685_p12, %p842_p4 }
  0x1f   : > { %305 = vrot.lane.b32.xlu0 %v764_v0, %s766_s13  ;;  %p687_p0 = pneg %p686_p13 }
  0x23   : > { %276 = vperm.xlu0 %678, %v270_v3  }
  0x27   : > { %398 = vrot.lane.b32.xlu0 %v764_v0, %s766_s13 }
  0x8d   : > { %v265_v4 = vpop.permute.xlu0 %264  ;;  %v308_v5 = vpop.permute.xlu1 %307 }
  0x8e   : > { %309 = vrot.lane.b32.xlu1 %v265_v4, %s766_s13 }
  0x91   : > { %v306_v7 = vpop.permute.xlu0 %305 }
  0x92   : > { %v312_v8 = vsel %vm311_vm1, %v306_v7, %v308_v5  ;;  %281 = vperm.xlu1 %679, %v271_v6  }
  0x93   : > { %600 = vmatprep.subr.bf16.mxu0 %v312_v8 }
  0x94   : > { %601 = vmatpush3.bf16.msra.mxu0 %v312_v8 }
  0xa2   : > { %v277_v11 = vpop.permute.xlu0 %276 }
  0xa6   : > { %v399_v26 = vpop.permute.xlu0 %398 }
 0x100   : > { %v310_v9 = vpop.permute.xlu1 %309 }
 0x101   : > { %602 = vmatprep.subr.bf16.mxu0 %v310_v9 }
 0x102   : > { %603 = vmatpush3.bf16.msra.mxu0 %v310_v9 }
 0x105   : > { %605 = vmatmul.mubr.msk.bf16.vlgmr.msra.gmra.mrb[0].mxu0 %vm315_vm0, %v682_v10 }
 0x111   : > { %v282_v14 = vpop.permute.xlu1 %281 }
 0x1d8   : > { %v606_v12 = vpop.f32.mrb[0].mxu0 }
 0x1d9   : > { %v356_v13 = vpop.f32.mrb[1].mxu0 }
 0x1da   : > { %v357_v16 = vadd.f32 %v356_v13, %v277_v11  ;;  %v607_v17 = vpop.f32.mrb[2].mxu0 }
 0x1db   : > { %v359_v18 = vpop.f32.mrb[3].mxu0 }
 0x1dc   : > { %v360_v19 = vadd.f32 %v359_v18, %v282_v14  ;;  %v371_v20 = vmax.f32 %v357_v16, 0.0 }
 0x1de   : > { %v372_v21 = vmax.f32 %v360_v19, 0.0 }
 0x1e0   : > { %v373_v22 = vpack.c.bf16 %v372_v21, %v371_v20 }
 0x1e2   : > { %376 = vrot.lane.b32.xlu1 %v373_v22, %s765_s12  ;;  %s688_s12 = sshll.u32 %s769_s21, 4  ;;  %s689_s12 = int_to_ptr.vmem [resolvable:$false] %s688_s12 }
 0x1e3   : > { %s690_s14 = scalar_lea.vmem %s689_s12, 256  ;;  %p691_p1 = scmp.lt.s32.totalorder %s909_s29, %s689_s12 }
 0x1e4   : > { %p692_p2 = scmp.lt.s32.totalorder %s690_s14, %s684_s11 }
 0x1e6   : > { %400 = vrot.lane.b32.xlu1 %v373_v22, %s766_s13  ;;  %p693_p3 = por %p692_p2, %p691_p1 }
 0x1e8   : > { %p694_p5 = pnand %p693_p3, %p687_p0 }
 0x1ea   : > { %384 = vperm.xlu1 %679, %v380_v23  }
 0x1ee   : > { %286 = vperm.xlu1 %679, %v272_v24  }
 0x254   : > { %v377_v25 = vpop.permute.xlu1 %376 }
 0x255   : > { %402 = vrot.lane.b32.xlu0 %v377_v25, %s766_s13 }
 0x258   : > { %v401_v28 = vpop.permute.xlu1 %400 }
 0x259   : > { %389 = vperm.xlu0 %678, %v381_v27   ;;  %v404_v29 = vsel %vm311_vm1, %v399_v26, %v401_v28 }
 0x25a   : > { %609 = vmatpush3.bf16.msra.mxu1 %v404_v29 }
 0x25b   : > { %610 = vmatprep.subr.bf16.mxu1 %v767_v15 }
 0x25d   : > { %291 = vperm.xlu0 %678, %v273_v30  }
 0x269   : > { %v385_v33 = vpop.permute.xlu1 %384 }
 0x26d   : > { %v287_v35 = vpop.permute.xlu1 %286 }
 0x26e   : > { %v365_v41 = vadd.f32 %v606_v12, %v287_v35 }
 0x2c7   : > { %v403_v31 = vpop.permute.xlu0 %402 }
 0x2c8   : > { %611 = vmatpush3.bf16.msra.mxu1 %v403_v31 }
 0x2cb   : > { %613 = vmatmul.mubr.msk.bf16.vlgmr.msra.gmra.mrb[0].mxu1 %vm315_vm0, %v683_v32 }
 0x2d8   : > { %v390_v34 = vpop.permute.xlu0 %389 }
 0x2dc   : > { %v292_v39 = vpop.permute.xlu0 %291 }
 0x2dd   : > { %v368_v45 = vadd.f32 %v607_v17, %v292_v39 }
 0x39e   : > { %v444_v36 = vpop.f32.mrb[0].mxu1 }
 0x39f   : > { %v445_v37 = vadd.f32 %v444_v36, %v385_v33  ;;  %v614_v38 = vpop.f32.mrb[1].mxu1 }
 0x3a0   : > { %v447_v40 = vpop.f32.mrb[2].mxu1 }
 0x3a1   : > { %v451_v42 = vmax.f32 %v445_v37, 0.0  ;;  %v448_v43 = vadd.f32 %v447_v40, %v390_v34  ;;  %v615_v44 = vpop.f32.mrb[3].mxu1 }
 0x3a3   : > { %v453_v46 = vadd.f32 %v451_v42, %v365_v41  ;;  %v452_v47 = vmax.f32 %v448_v43, 0.0 }
 0x3a5   : > { %v454_v48 = vadd.f32 %v452_v47, %v368_v45  ;;  %v455_v49 = vmax.f32 %v453_v46, 0.0 }
 0x3a7   : > { %v456_v50 = vmax.f32 %v454_v48, 0.0 }
 0x3a9   : > { %v591_v51 = vpack.c.bf16 %v456_v50, %v455_v49 }
 0x3ab   : > { %592 = vst [vmem:[%s239_s27] sm:$0xff] %v591_v51  }
 0x3ac   : > { %697 = shalt.err (!%p694_p5)
}
 0x3ad   : > { %s698_s15 = scalar_lea.hbm %s907_s9, 128  ;;  %s702_s17 = scalar_lea.hbm %s962_s5, 256 }
 0x3ae   : > { %p699_p6 = scmp.ne.s32.totalorder %s907_s9, %s698_s15  ;;  %p703_p10 = scmp.lt.u32.totalorder %s907_s9, %s962_s5 }
 0x3af   : > { %p704_p11 = scmp.lt.u32.totalorder %s702_s17, %s698_s15  ;;  %p706_p13 = scmp.lt.u32.totalorder %s698_s15, %s907_s9 }
 0x3b0   : > { %p700_p7 = pnand %p699_p6, %p842_p4 }
 0x3b1   : > { %p705_p12 = por %p704_p11, %p703_p10 }
 0x3b2   : > { %p701_p9 = pneg %p700_p7 }
 0x3b3   : > { %p707_p0 = por %p706_p13, %p705_p12 }
 0x3b5   : > { %p708_p1 = pnand %p707_p0, %p701_p9 }
 0x3b7   : > { %711 = shalt.err (!%p708_p1)
}
 0x3b8   : > { %s770_s27 = smov 64   ;;  %s771_s7 = smov 4  }
 0x3b9   : > { %616 = dma.vmem_to_hbm [thread:$0]  (%p842_p4), %s909_s29, 128, %s907_s9, %s911_s10, %s770_s27, %s770_s27, %s771_s7  }
 0x3ba PF: > { %p622_p2 = scmp.ge.s32.totalorder %s762_s23, 2  ;;  %s499_s8 = sand.u32 1, %s742_s18  }
 0x3bb   : > { %s500_s11 = scalar_lea.sflag [#allocation5], %s499_s8 }
 0x3bc   : > { %p619_p3 = pnand %p622_p2, %p849_p8 }
 0x3be   : > { %737 = dma.done.wait (!%p619_p3), %s500_s11, 128  }
 0x3bf   : > { %739 = vsyncadd (!%p619_p3), %s500_s11, 4294967168  ;;  %s18_s23 = sadd.s32 1, %s762_s23   ;;  %s965_s18 = smov %s746_s19 }
 0x3c0   : > { %p15_p5 = scmp.ge.s32.totalorder %s18_s23, 4   ;;  %s966_s19 = smov %s750_s20 }
 0x3c1   : > { %s967_s20 = smov %s855_s6  ;;  %s968_s21 = smov %s758_s22 }
 0x3c2   : > { %s969_s22 = smov %s971_s26  ;;  %17 = sbr.rel (!%p15_p5) target bundleno = 4 (0x4), region = 79 }
 0x3c9   :  { %505 = vsyncpa [#allocation5], 1 }
 0x3ca   :  { %507 = vsyncpa [#allocation5 + $0x1], 1 }

</bundles_post_ra>
